<compile_context>
chip_gen: v6e
topology: v6e:2x2x1
jax: 0.10.0
libtpu: 0.0.40
codegen_flags: <defaults>
</compile_context>

<pallas_src>
import jax
import jax.numpy as jnp
from jax.experimental import pallas as pl
from jax.experimental.pallas import tpu as pltpu


# ----------------------------------------------------------------------------- helpers
def _round_up(n, m):
    return ((n + m - 1) // m) * m


def _pad2(a, rows, cols):
    r, c = a.shape
    if r == rows and c == cols:
        return a
    return jnp.pad(a, ((0, rows - r), (0, cols - c)))


def _device_kind():
    try:
        return jax.devices()[0].device_kind.lower()
    except Exception:
        return ""


def _default_compute_dtype():
    """bf16 MXU operands on every TPU generation (f32 accumulation via
    preferred_element_type); f32 fallback off-TPU."""
    try:
        if jax.devices()[0].platform == "tpu":
            return jnp.bfloat16
    except Exception:
        pass
    return jnp.float32


def _choose_tile_m(batch, compute_dtype, device_kind):
    sub = 16 if jnp.dtype(compute_dtype) == jnp.dtype(jnp.bfloat16) else 8
    tile = min(2048, _round_up(batch, sub))
    # v7x has 2 TensorCores sharing the ("parallel",) batch axis: keep >= 2 steps.
    if "v7" in device_kind and batch >= 2 * sub:
        tile = min(tile, _round_up(pl.cdiv(batch, 2), sub))
    return max(sub, tile)


# ----------------------------------------------------------------------------- kernel
def network_head_kernel(scale_ref, shift_ref, x_ref, w1_ref, b1_ref,
                        w2_ref, b2_ref, w3_ref, b3_ref, o_ref):
    compute_dtype = w1_ref.dtype

    # Network tail prologue: inference BatchNorm1d folded to per-feature
    # scale/shift, then ReLU (dropout p=0.0 is identity).  All in f32.
    h = x_ref[...].astype(jnp.float32) * scale_ref[...] + shift_ref[...]
    h = jnp.maximum(h, 0.0)

    # MLPClassifier layer 0: Linear + ReLU  (MXU in compute dtype, f32 accum)
    h = jnp.dot(h.astype(compute_dtype), w1_ref[...],
                preferred_element_type=jnp.float32)
    h = jnp.maximum(h + b1_ref[...], 0.0)

    # MLPClassifier layer 1: Linear + ReLU
    h = jnp.dot(h.astype(compute_dtype), w2_ref[...],
                preferred_element_type=jnp.float32)
    h = jnp.maximum(h + b2_ref[...], 0.0)

    # MLPClassifier head: Linear, no activation
    y = jnp.dot(h.astype(compute_dtype), w3_ref[...],
                preferred_element_type=jnp.float32)
    o_ref[...] = (y + b3_ref[...]).astype(o_ref.dtype)


# ----------------------------------------------------------------------------- param prep (hoisted, call once)
def prepare_network_head_params(bn_params, mlp_params, compute_dtype=None):
    """One-time parameter prep: fold inference BN into scale/shift, cast weights
    to the MXU compute dtype, zero-pad hidden dims to 128 lanes (zero rows/cols
    are exact no-ops through Linear+ReLU).  Input / output dims stay unpadded.
    """
    if compute_dtype is None:
        compute_dtype = _default_compute_dtype()
    gamma, beta, mean, var, eps = bn_params
    (w1, b1), (w2, b2), (w3, b3) = mlp_params

    d_in, h1 = w1.shape
    h2 = w2.shape[1]
    d_out = w3.shape[1]
    h1_p, h2_p = _round_up(h1, 128), _round_up(h2, 128)

    inv_std = 1.0 / jnp.sqrt(var + eps)
    scale = (gamma * inv_std).reshape(1, d_in).astype(jnp.float32)
    shift = (beta - mean * gamma * inv_std).reshape(1, d_in).astype(jnp.float32)

    w1_p = _pad2(w1.astype(compute_dtype), d_in, h1_p)
    b1_p = _pad2(b1.reshape(1, h1).astype(jnp.float32), 1, h1_p)
    w2_p = _pad2(w2.astype(compute_dtype), h1_p, h2_p)
    b2_p = _pad2(b2.reshape(1, h2).astype(jnp.float32), 1, h2_p)
    w3_p = _pad2(w3.astype(compute_dtype), h2_p, d_out)
    b3_p = b3.reshape(1, d_out).astype(jnp.float32)

    dims = dict(d_in=d_in, h1=h1, h2=h2, d_out=d_out, h1_p=h1_p, h2_p=h2_p,
                compute_dtype=compute_dtype)
    tensors = (scale, shift, w1_p, b1_p, w2_p, b2_p, w3_p, b3_p)
    return tensors, dims


# ----------------------------------------------------------------------------- wrapper
def network_head_forward(x, prepared, *, tile_m=None):
    """Fused Network tail: relu(batchnorm_h(x)) -> MLPClassifier -> logits.

    x:        (batch, feature_dim) float32 (kept f32; BN+ReLU run in f32 in-kernel)
    prepared: result of prepare_network_head_params(...)
    """
    tensors, dims = prepared
    scale, shift, w1, b1, w2, b2, w3, b3 = tensors
    d_in, h1, h2, d_out = dims["d_in"], dims["h1"], dims["h2"], dims["d_out"]
    h1_p, h2_p = dims["h1_p"], dims["h2_p"]
    compute_dtype = dims["compute_dtype"]
    itemsize = jnp.dtype(compute_dtype).itemsize

    batch, xf = x.shape
    assert xf == d_in, "feature_dim mismatch between x and prepared params"
    x = x.astype(jnp.float32)

    kind = _device_kind()
    if tile_m is None:
        tile_m = _choose_tile_m(batch, compute_dtype, kind)
    else:
        tile_m = _round_up(tile_m, 16)
    grid = (pl.cdiv(batch, tile_m),)

    # VMEM budget: double-buffered inputs/outputs + f32 intermediates + margin.
    w_bytes = (d_in * h1_p + h1_p * h2_p + h2_p * d_out) * itemsize
    small_bytes = (2 * d_in + h1_p + h2_p + d_out) * 4
    io_bytes = tile_m * d_in * 4 + tile_m * d_out * 4
    scratch_bytes = 6 * tile_m * max(d_in, h1_p, h2_p, 128) * 4
    need = 2 * (w_bytes + small_bytes + io_bytes) + scratch_bytes + (4 << 20)
    vmem_limit = int(min(48 << 20, max(16 << 20, need)))

    # Cost estimate from the REAL (unpadded) dims.
    cost = pl.CostEstimate(
        flops=2 * batch * (d_in * h1 + h1 * h2 + h2 * d_out) + 4 * batch * d_in,
        transcendentals=0,
        bytes_accessed=(batch * d_in * 4
                        + (d_in * h1 + h1 * h2 + h2 * d_out) * itemsize
                        + (2 * d_in + h1 + h2 + d_out) * 4
                        + batch * d_out * 4),
    )

    def resident(r, c):
        return pl.BlockSpec((r, c), lambda i: (0, 0))

    in_specs = [
        resident(1, d_in),                                 # BN scale
        resident(1, d_in),                                 # BN shift
        pl.BlockSpec((tile_m, d_in), lambda i: (i, 0)),    # x tile (f32, unpadded)
        resident(d_in, h1_p),                              # W1
        resident(1, h1_p),                                 # b1
        resident(h1_p, h2_p),                              # W2
        resident(1, h2_p),                                 # b2
        resident(h2_p, d_out),                             # W3 (output dim unpadded)
        resident(1, d_out),                                # b3
    ]
    out_specs = pl.BlockSpec((tile_m, d_out), lambda i: (i, 0))

    out = pl.pallas_call(
        network_head_kernel,
        out_shape=jax.ShapeDtypeStruct((batch, d_out), jnp.float32),
        grid=grid,
        in_specs=in_specs,
        out_specs=out_specs,
        compiler_params=pltpu.CompilerParams(
            dimension_semantics=("parallel",),
            vmem_limit_bytes=vmem_limit,
        ),
        cost_estimate=cost,
    )(scale, shift, x, w1, b1, w2, b2, w3, b3)

    return out


# ----------------------------------------------------------------------------- init & reference
def init_mlp_params(key, input_dim, output_dim, L=2):
    """Mirrors MLPClassifier's layer shapes; W stored transposed (in, out)."""
    dims = [input_dim // (2 ** l) for l in range(L + 1)] + [output_dim]
    params = []
    for l in range(L + 1):
        key, kw, kb = jax.random.split(key, 3)
        fan_in, fan_out = dims[l], dims[l + 1]
        bound = 1.0 / (fan_in ** 0.5)
        w = jax.random.uniform(kw, (fan_in, fan_out), jnp.float32, -bound, bound)
        b = jax.random.uniform(kb, (1, fan_out), jnp.float32, -bound, bound)
        params.append((w, b))
    return params


def init_bn_params(key, dim, eps=1e-5):
    kg, kb, km, kv = jax.random.split(key, 4)
    gamma = 1.0 + 0.1 * jax.random.normal(kg, (dim,), jnp.float32)
    beta = 0.1 * jax.random.normal(kb, (dim,), jnp.float32)
    mean = 0.1 * jax.random.normal(km, (dim,), jnp.float32)
    var = jax.random.uniform(kv, (dim,), jnp.float32, 0.5, 1.5)
    return gamma, beta, mean, var, eps


def network_head_reference(x, bn_params, mlp_params):
    gamma, beta, mean, var, eps = bn_params
    (w1, b1), (w2, b2), (w3, b3) = mlp_params
    h = (x - mean) / jnp.sqrt(var + eps) * gamma + beta
    h = jnp.maximum(h, 0.0)
    h = jnp.maximum(h @ w1 + b1, 0.0)
    h = jnp.maximum(h @ w2 + b2, 0.0)
    return h @ w3 + b3


# ----------------------------------------------------------------------------- main
if __name__ == "__main__":
    batch, feature_dim, num_classes = 8, 32, 8   # classifier = MLPClassifier(feature_dim, num_classes)

    key = jax.random.PRNGKey(0)
    key, kx, kbn = jax.random.split(key, 3)
    x = jax.random.normal(kx, (batch, feature_dim), dtype=jnp.float32)
    mlp_params = init_mlp_params(key, feature_dim, num_classes, L=2)
    bn_params = init_bn_params(kbn, feature_dim)

    # Parameter prep (BN fold, bf16 cast, 128-lane padding) hoisted out of the
    # per-call path: done exactly once.
    prepared = prepare_network_head_params(bn_params, mlp_params)

    out = network_head_forward(x, prepared)
    out = jax.block_until_ready(out)

    ref = network_head_reference(x, bn_params, mlp_params)
    assert out.shape == (batch, num_classes)

    cdt = prepared[1]["compute_dtype"]
    tol = 3e-2 if jnp.dtype(cdt) == jnp.dtype(jnp.bfloat16) else 1e-5
    assert jnp.allclose(out, ref, atol=tol, rtol=tol), "mismatch vs reference"

    print("KERNEL_OK")
</pallas_src>

<mosaic_0001>
module attributes {stable_mosaic.version = 11 : i64} {
  func.func @network_head_kernel(%arg0: i32, %arg1: memref<1x32xf32, #tpu.memory_space<vmem>>, %arg2: memref<1x32xf32, #tpu.memory_space<vmem>>, %arg3: memref<8x32xf32, #tpu.memory_space<vmem>>, %arg4: memref<32x128xf32, #tpu.memory_space<vmem>>, %arg5: memref<1x128xf32, #tpu.memory_space<vmem>>, %arg6: memref<128x128xf32, #tpu.memory_space<vmem>>, %arg7: memref<1x128xf32, #tpu.memory_space<vmem>>, %arg8: memref<128x8xf32, #tpu.memory_space<vmem>>, %arg9: memref<1x8xf32, #tpu.memory_space<vmem>>, %arg10: memref<8x8xf32, #tpu.memory_space<vmem>>) attributes {dimension_semantics = [#tpu.dimension_semantics<parallel>], iteration_bounds = array<i64: 1>, scalar_prefetch = 0 : i64, scratch_operands = 0 : i64, tpu.core_type = #tpu.core_type<tc>, window_params = [{pipeline_mode = #tpu.pipeline_mode<synchronous>, transform_indices = @transform_0, window_bounds = array<i64: 1, 32>}, {pipeline_mode = #tpu.pipeline_mode<synchronous>, transform_indices = @transform_1, window_bounds = array<i64: 1, 32>}, {transform_indices = @transform_2, window_bounds = array<i64: 8, 32>}, {pipeline_mode = #tpu.pipeline_mode<synchronous>, transform_indices = @transform_3, window_bounds = array<i64: 32, 128>}, {pipeline_mode = #tpu.pipeline_mode<synchronous>, transform_indices = @transform_4, window_bounds = array<i64: 1, 128>}, {pipeline_mode = #tpu.pipeline_mode<synchronous>, transform_indices = @transform_5, window_bounds = array<i64: 128, 128>}, {pipeline_mode = #tpu.pipeline_mode<synchronous>, transform_indices = @transform_6, window_bounds = array<i64: 1, 128>}, {pipeline_mode = #tpu.pipeline_mode<synchronous>, transform_indices = @transform_7, window_bounds = array<i64: 128, 8>}, {pipeline_mode = #tpu.pipeline_mode<synchronous>, transform_indices = @transform_8, window_bounds = array<i64: 1, 8>}, {transform_indices = @transform_9, window_bounds = array<i64: 8, 8>}]} {
    %c0 = arith.constant 0 : index
    %c0_0 = arith.constant 0 : index
    %0 = vector.load %arg3[%c0, %c0_0] : memref<8x32xf32, #tpu.memory_space<vmem>>, vector<8x32xf32>
    %c0_1 = arith.constant 0 : index
    %c0_2 = arith.constant 0 : index
    %1 = vector.load %arg1[%c0_1, %c0_2] : memref<1x32xf32, #tpu.memory_space<vmem>>, vector<1x32xf32>
    %2 = vector.broadcast %1 : vector<1x32xf32> to vector<8x32xf32>
    %3 = arith.mulf %0, %2 : vector<8x32xf32>
    %c0_3 = arith.constant 0 : index
    %c0_4 = arith.constant 0 : index
    %4 = vector.load %arg2[%c0_3, %c0_4] : memref<1x32xf32, #tpu.memory_space<vmem>>, vector<1x32xf32>
    %5 = vector.broadcast %4 : vector<1x32xf32> to vector<8x32xf32>
    %6 = arith.addf %3, %5 : vector<8x32xf32>
    %cst = arith.constant 0.000000e+00 : f32
    %7 = vector.broadcast %cst : f32 to vector<8x32xf32>
    %8 = arith.maximumf %6, %7 : vector<8x32xf32>
    %c0_5 = arith.constant 0 : index
    %c0_6 = arith.constant 0 : index
    %9 = vector.load %arg4[%c0_5, %c0_6] : memref<32x128xf32, #tpu.memory_space<vmem>>, vector<32x128xf32>
    %cst_7 = arith.constant dense<0.000000e+00> : vector<8x128xf32>
    %10 = tpu.matmul %8, %9, %cst_7 {dimension_numbers = #tpu.dot_dimension_numbers<[1], [0], [0], [1], [0, 0, 1, 1], [], []>} : vector<8x32xf32>, vector<32x128xf32>, vector<8x128xf32> -> vector<8x128xf32>
    %c0_8 = arith.constant 0 : index
    %c0_9 = arith.constant 0 : index
    %11 = vector.load %arg5[%c0_8, %c0_9] : memref<1x128xf32, #tpu.memory_space<vmem>>, vector<1x128xf32>
    %12 = vector.broadcast %11 : vector<1x128xf32> to vector<8x128xf32>
    %13 = arith.addf %10, %12 : vector<8x128xf32>
    %cst_10 = arith.constant 0.000000e+00 : f32
    %14 = vector.broadcast %cst_10 : f32 to vector<8x128xf32>
    %15 = arith.maximumf %13, %14 : vector<8x128xf32>
    %c0_11 = arith.constant 0 : index
    %c0_12 = arith.constant 0 : index
    %16 = vector.load %arg6[%c0_11, %c0_12] : memref<128x128xf32, #tpu.memory_space<vmem>>, vector<128x128xf32>
    %cst_13 = arith.constant dense<0.000000e+00> : vector<8x128xf32>
    %17 = tpu.matmul %15, %16, %cst_13 {dimension_numbers = #tpu.dot_dimension_numbers<[1], [0], [0], [1], [0, 0, 1, 1], [], []>} : vector<8x128xf32>, vector<128x128xf32>, vector<8x128xf32> -> vector<8x128xf32>
    %c0_14 = arith.constant 0 : index
    %c0_15 = arith.constant 0 : index
    %18 = vector.load %arg7[%c0_14, %c0_15] : memref<1x128xf32, #tpu.memory_space<vmem>>, vector<1x128xf32>
    %19 = vector.broadcast %18 : vector<1x128xf32> to vector<8x128xf32>
    %20 = arith.addf %17, %19 : vector<8x128xf32>
    %cst_16 = arith.constant 0.000000e+00 : f32
    %21 = vector.broadcast %cst_16 : f32 to vector<8x128xf32>
    %22 = arith.maximumf %20, %21 : vector<8x128xf32>
    %c0_17 = arith.constant 0 : index
    %c0_18 = arith.constant 0 : index
    %23 = vector.load %arg8[%c0_17, %c0_18] : memref<128x8xf32, #tpu.memory_space<vmem>>, vector<128x8xf32>
    %cst_19 = arith.constant dense<0.000000e+00> : vector<8x8xf32>
    %24 = tpu.matmul %22, %23, %cst_19 {dimension_numbers = #tpu.dot_dimension_numbers<[1], [0], [0], [1], [0, 0, 1, 1], [], []>} : vector<8x128xf32>, vector<128x8xf32>, vector<8x8xf32> -> vector<8x8xf32>
    %c0_20 = arith.constant 0 : index
    %c0_21 = arith.constant 0 : index
    %25 = vector.load %arg9[%c0_20, %c0_21] : memref<1x8xf32, #tpu.memory_space<vmem>>, vector<1x8xf32>
    %26 = vector.broadcast %25 : vector<1x8xf32> to vector<8x8xf32>
    %27 = arith.addf %24, %26 : vector<8x8xf32>
    %c0_22 = arith.constant 0 : index
    %c0_23 = arith.constant 0 : index
    %28 = vector.load %arg10[%c0_22, %c0_23] : memref<8x8xf32, #tpu.memory_space<vmem>>, vector<8x8xf32>
    tpu.vector_store %arg10[%c0_22, %c0_23], %27 {strides = array<i32>} : memref<8x8xf32, #tpu.memory_space<vmem>>, vector<8x8xf32>,
    return
  }
  func.func @transform_0(%arg0: i32) -> (i32, i32) {
    %c0_i32 = arith.constant 0 : i32
    %c0_i32_0 = arith.constant 0 : i32
    %c0_i32_1 = arith.constant 0 : i32
    return %c0_i32, %c0_i32_0 : i32, i32
  }
  func.func @transform_1(%arg0: i32) -> (i32, i32) {
    %c0_i32 = arith.constant 0 : i32
    %c0_i32_0 = arith.constant 0 : i32
    %c0_i32_1 = arith.constant 0 : i32
    return %c0_i32, %c0_i32_0 : i32, i32
  }
  func.func @transform_2(%arg0: i32) -> (i32, i32) {
    %c0_i32 = arith.constant 0 : i32
    %c0_i32_0 = arith.constant 0 : i32
    return %arg0, %c0_i32 : i32, i32
  }
  func.func @transform_3(%arg0: i32) -> (i32, i32) {
    %c0_i32 = arith.constant 0 : i32
    %c0_i32_0 = arith.constant 0 : i32
    %c0_i32_1 = arith.constant 0 : i32
    return %c0_i32, %c0_i32_0 : i32, i32
  }
  func.func @transform_4(%arg0: i32) -> (i32, i32) {
    %c0_i32 = arith.constant 0 : i32
    %c0_i32_0 = arith.constant 0 : i32
    %c0_i32_1 = arith.constant 0 : i32
    return %c0_i32, %c0_i32_0 : i32, i32
  }
  func.func @transform_5(%arg0: i32) -> (i32, i32) {
    %c0_i32 = arith.constant 0 : i32
    %c0_i32_0 = arith.constant 0 : i32
    %c0_i32_1 = arith.constant 0 : i32
    return %c0_i32, %c0_i32_0 : i32, i32
  }
  func.func @transform_6(%arg0: i32) -> (i32, i32) {
    %c0_i32 = arith.constant 0 : i32
    %c0_i32_0 = arith.constant 0 : i32
    %c0_i32_1 = arith.constant 0 : i32
    return %c0_i32, %c0_i32_0 : i32, i32
  }
  func.func @transform_7(%arg0: i32) -> (i32, i32) {
    %c0_i32 = arith.constant 0 : i32
    %c0_i32_0 = arith.constant 0 : i32
    %c0_i32_1 = arith.constant 0 : i32
    return %c0_i32, %c0_i32_0 : i32, i32
  }
  func.func @transform_8(%arg0: i32) -> (i32, i32) {
    %c0_i32 = arith.constant 0 : i32
    %c0_i32_0 = arith.constant 0 : i32
    %c0_i32_1 = arith.constant 0 : i32
    return %c0_i32, %c0_i32_0 : i32, i32
  }
  func.func @transform_9(%arg0: i32) -> (i32, i32) {
    %c0_i32 = arith.constant 0 : i32
    %c0_i32_0 = arith.constant 0 : i32
    return %arg0, %c0_i32 : i32, i32
  }
}

</mosaic_0001>

<bundles_post_ra>
// kernel: tpu_custom_call.1
= control target key start
LH: loop header
LB: loop body
LE: loop exit
PB: predicated region body
PF: predicated region fallthrough
CT: control target
= control target key end

     0   :  { %14 = vsyncpa [#allocation3], 0  ;;  %s749_s0 = inlined_call_operand.vmem [shape: f32[1,32], index: 0, kind: input, shape index: {}]   ;;  %s750_s1 = inlined_call_operand.vmem [shape: f32[1,32], index: 1, kind: input, shape index: {}]   ;;  %s751_s2 = inlined_call_operand.vmem [shape: f32[8,32], index: 2, kind: input, shape index: {}]   ;;  %s752_s3 = inlined_call_operand.hbm [shape: f32[32,128], index: 3, kind: input, shape index: {}]   ;;  %s753_s4 = inlined_call_operand.vmem [shape: f32[1,128], index: 4, kind: input, shape index: {}]   ;;  %s754_s5 = inlined_call_operand.vmem [shape: f32[128,128], index: 5, kind: input, shape index: {}]   ;;  %s755_s6 = inlined_call_operand.vmem [shape: f32[1,128], index: 6, kind: input, shape index: {}]   ;;  %s756_s7 = inlined_call_operand.vmem [shape: f32[128,8], index: 7, kind: input, shape index: {}]   ;;  %s757_s8 = inlined_call_operand.vmem [shape: f32[1,8], index: 8, kind: input, shape index: {}]   ;;  %s758_s9 = inlined_call_operand.hbm [shape: f32[8,8], index: 9, kind: output, shape index: {}]  }
   0x1   :  { %15 = vsyncpa [#allocation4], 0  ;;  %s531_s30 = smov [#allocation2]  }
   0x2   :  { %s27_s10 = sshll.u32 %s531_s30, 4  ;;  %s28_s10 = int_to_ptr.vmem [resolvable:$true] %s27_s10 }
   0x3   :  { %s495_s11 = scalar_lea.vmem %s28_s10, 512  ;;  %p500_p1 = scmp.lt.s32.totalorder %s28_s10, %s28_s10 }
   0x4   :  { %p496_p0 = scmp.ne.s32.totalorder %s28_s10, %s495_s11  ;;  %p501_p2 = scmp.lt.s32.totalorder %s495_s11, %s495_s11 }
   0x6   :  { %p502_p3 = por %p501_p2, %p500_p1 }
   0x8   :  { %p503_p4 = pnand %p502_p3, %p496_p0 }
   0xa   :  { %506 = shalt.err (!%p503_p4)
}
   0xb   :  { %s532_s12 = smov 128   ;;  %s533_s13 = smov 8  }
   0xc   :  { %33 = dma.hbm_to_vmem [thread:$0]  %s752_s3, 512, %s28_s10, [#allocation3], %s532_s12, %s532_s12, %s533_s13  }
   0xd   :  { %527 = dma.done.wait [#allocation3], 512  }
   0xe   :  { %528 = vsyncadd [#allocation3], 4294966784  ;;  %v534_v0 = vmov 0.0   ;;  %vm535_vm0 = vmmov 0   ;;  %v68_v1 = vld [vmem:[#allocation2 + $0x18] sm:$0xff]  ;;  %v67_v2 = vld [vmem:[#allocation2 + $0x10] sm:$0xff] }
   0xf   :  { %400 = vmatprep.subr.mxu0 %v534_v0  ;;  %408 = vmatprep.mubr.msk.f32.mxu0 %vm535_vm0, %v534_v0  ;;  %v66_v3 = vld [vmem:[#allocation2 + $0x8] sm:$0xff]  ;;  %v47_v4 = vld [vmem:[%s751_s2] sm:$0xff]  ;;  %v166_v8 = vld [vmem:[%s754_s5 + $0x78] sm:$0xff]  ;;  %vm76_vm1 = vcmask 261120   ;;  %s536_s14 = smov [#allocation5]   ;;  %vm338_vm2 = vcmask 64512  }
  0x10   :  { %411 = vmatprep.subr.mxu1 %v534_v0  ;;  %443 = vmatprep.mubr.msk.f32.mxu1 %vm535_vm0, %v534_v0  ;;  %v355_v5 = vld [vmem:[%s749_s0] ss:$0 sm:$0xff]  ;;  %v165_v9 = vld [vmem:[%s754_s5 + $0x70] sm:$0xff]  ;;  %v164_v12 = vld [vmem:[%s754_s5 + $0x68] sm:$0xff]  ;;  %s346_s15 = sshll.u32 %s536_s14, 4  ;;  %s347_s15 = int_to_ptr.vmem [resolvable:$true] %s346_s15 }
  0x11   :  { %401 = vmatpush3.msra.mxu0 %v68_v1  ;;  %v55_v6 = vmul.f32 %v355_v5, %v47_v4  ;;  %v356_v7 = vld [vmem:[%s750_s1] ss:$0 sm:$0xff]  ;;  %412 = vmatpush3.msra.mxu1 %v166_v8  ;;  %v162_v15 = vld [vmem:[%s754_s5 + $0x58] sm:$0xff]  ;;  %v161_v16 = vld [vmem:[%s754_s5 + $0x50] sm:$0xff]  ;;  %p512_p6 = scmp.lt.s32.totalorder %s347_s15, %s347_s15 }
  0x12   :  { %402 = vmatprep.subr.mxu0 %v534_v0  ;;  %v65_v10 = vld [vmem:[#allocation2] sm:$0xff]  ;;  %413 = vmatprep.subr.mxu1 %v534_v0  ;;  %v160_v17 = vld [vmem:[%s754_s5 + $0x48] sm:$0xff]  ;;  %v158_v19 = vld [vmem:[%s754_s5 + $0x38] sm:$0xff] }
  0x13   :  { %403 = vmatpush3.msra.mxu0 %v67_v2  ;;  %v63_v11 = vadd.f32 %v356_v7, %v55_v6  ;;  %414 = vmatpush3.msra.mxu1 %v165_v9  ;;  %v163_v14 = vld [vmem:[%s754_s5 + $0x60] sm:$0xff]  ;;  %v157_v20 = vld [vmem:[%s754_s5 + $0x30] sm:$0xff]  ;;  %v156_v21 = vld [vmem:[%s754_s5 + $0x28] sm:$0xff] }
  0x14   :  { %404 = vmatprep.subr.mxu0 %v534_v0  ;;  %415 = vmatprep.subr.mxu1 %v534_v0  ;;  %v159_v18 = vld [vmem:[%s754_s5 + $0x40] sm:$0xff]  ;;  %v154_v23 = vld [vmem:[%s754_s5 + $0x18] sm:$0xff]  ;;  %v153_v24 = vld [vmem:[%s754_s5 + $0x10] sm:$0xff] }
  0x15   :  { %405 = vmatpush3.msra.mxu0 %v66_v3  ;;  %v64_v13 = vmax.f32 %v63_v11, 0.0  ;;  %416 = vmatpush3.msra.mxu1 %v164_v12  ;;  %v155_v22 = vld [vmem:[%s754_s5 + $0x20] sm:$0xff]  ;;  %v152_v25 = vld [vmem:[%s754_s5 + $0x8] sm:$0xff]  ;;  %v260_v27 = vld [vmem:[%s756_s7 + $0x78] sm:$0xff] }
  0x16   :  { %406 = vmatprep.subr.mxu0 %v534_v0  ;;  %417 = vmatprep.subr.mxu1 %v534_v0  ;;  %v151_v26 = vld [vmem:[%s754_s5] sm:$0xff]  ;;  %v259_v28 = vld [vmem:[%s756_s7 + $0x70] sm:$0xff]  ;;  %v258_v29 = vld [vmem:[%s756_s7 + $0x68] sm:$0xff] }
  0x17   :  { %407 = vmatpush3.msra.mxu0 %v65_v10  ;;  %418 = vmatpush3.msra.mxu1 %v163_v14  ;;  %v257_v30 = vld [vmem:[%s756_s7 + $0x60] sm:$0xff]  ;;  %v256_v31 = vld [vmem:[%s756_s7 + $0x58] sm:$0xff]  ;;  %v255_v32 = vld [vmem:[%s756_s7 + $0x50] sm:$0xff] }
  0x18   :  { %409 = vmatmul.mubr.msk.f32.vlgmr.msra.gmra.mxu0 %vm76_vm1, %v64_v13  ;;  %446 = vmatprep.subr.mxu0 %v534_v0  ;;  %v254_v33 = vld [vmem:[%s756_s7 + $0x48] sm:$0xff]  ;;  %v253_v34 = vld [vmem:[%s756_s7 + $0x40] sm:$0xff]  ;;  %v252_v35 = vld [vmem:[%s756_s7 + $0x38] sm:$0xff] }
  0x19   :  { %419 = vmatprep.subr.mxu1 %v534_v0  ;;  %478 = vmatprep.mubr.msk.f32.mxu0 %vm535_vm0, %v534_v0  ;;  %v251_v36 = vld [vmem:[%s756_s7 + $0x30] sm:$0xff]  ;;  %v250_v37 = vld [vmem:[%s756_s7 + $0x28] sm:$0xff]  ;;  %v249_v38 = vld [vmem:[%s756_s7 + $0x20] sm:$0xff] }
  0x1a   :  { %420 = vmatpush3.msra.mxu1 %v162_v15  ;;  %447 = vmatpush3.msra.mxu0 %v260_v27  ;;  %v248_v39 = vld [vmem:[%s756_s7 + $0x18] sm:$0xff]  ;;  %v357_v40 = vld [vmem:[%s753_s4] ss:$0 sm:$0xff]  ;;  %v247_v45 = vld [vmem:[%s756_s7 + $0x10] sm:$0xff] }
  0x1b   :  { %421 = vmatprep.subr.mxu1 %v534_v0  ;;  %448 = vmatprep.subr.mxu0 %v534_v0  ;;  %v246_v46 = vld [vmem:[%s756_s7 + $0x8] sm:$0xff]  ;;  %v245_v47 = vld [vmem:[%s756_s7] sm:$0xff]  ;;  %s507_s7 = scalar_lea.vmem %s347_s15, 128 }
  0x1c   :  { %422 = vmatpush3.msra.mxu1 %v161_v16  ;;  %449 = vmatpush3.msra.mxu0 %v259_v28  ;;  %v359_v48 = vld [vmem:[%s755_s6] ss:$0 sm:$0xff]  ;;  %p508_p5 = scmp.ne.s32.totalorder %s347_s15, %s507_s7  ;;  %p513_p7 = scmp.lt.s32.totalorder %s507_s7, %s507_s7 }
  0x1d   :  { %423 = vmatprep.subr.mxu1 %v534_v0  ;;  %450 = vmatprep.subr.mxu0 %v534_v0  ;;  %v360_v53 = vld [vmem:[%s757_s8] ss:$0 sm:$0xff] }
  0x1e   :  { %424 = vmatpush3.msra.mxu1 %v160_v17  ;;  %451 = vmatpush3.msra.mxu0 %v258_v29  ;;  %p514_p8 = por %p513_p7, %p512_p6 }
  0x1f   :  { %425 = vmatprep.subr.mxu1 %v534_v0  ;;  %452 = vmatprep.subr.mxu0 %v534_v0 }
  0x20   :  { %426 = vmatpush3.msra.mxu1 %v159_v18  ;;  %453 = vmatpush3.msra.mxu0 %v257_v30  ;;  %p515_p9 = pnand %p514_p8, %p508_p5 }
  0x21   :  { %427 = vmatprep.subr.mxu1 %v534_v0  ;;  %454 = vmatprep.subr.mxu0 %v534_v0 }
  0x22   :  { %428 = vmatpush3.msra.mxu1 %v158_v19  ;;  %455 = vmatpush3.msra.mxu0 %v256_v31 }
  0x23   :  { %429 = vmatprep.subr.mxu1 %v534_v0  ;;  %456 = vmatprep.subr.mxu0 %v534_v0 }
  0x24   :  { %430 = vmatpush3.msra.mxu1 %v157_v20  ;;  %457 = vmatpush3.msra.mxu0 %v255_v32 }
  0x25   :  { %431 = vmatprep.subr.mxu1 %v534_v0  ;;  %458 = vmatprep.subr.mxu0 %v534_v0 }
  0x26   :  { %432 = vmatpush3.msra.mxu1 %v156_v21  ;;  %459 = vmatpush3.msra.mxu0 %v254_v33 }
  0x27   :  { %433 = vmatprep.subr.mxu1 %v534_v0  ;;  %460 = vmatprep.subr.mxu0 %v534_v0 }
  0x28   :  { %434 = vmatpush3.msra.mxu1 %v155_v22  ;;  %461 = vmatpush3.msra.mxu0 %v253_v34 }
  0x29   :  { %435 = vmatprep.subr.mxu1 %v534_v0  ;;  %462 = vmatprep.subr.mxu0 %v534_v0 }
  0x2a   :  { %436 = vmatpush3.msra.mxu1 %v154_v23  ;;  %463 = vmatpush3.msra.mxu0 %v252_v35 }
  0x2b   :  { %437 = vmatprep.subr.mxu1 %v534_v0  ;;  %464 = vmatprep.subr.mxu0 %v534_v0 }
  0x2c   :  { %438 = vmatpush3.msra.mxu1 %v153_v24  ;;  %465 = vmatpush3.msra.mxu0 %v251_v36 }
  0x2d   :  { %439 = vmatprep.subr.mxu1 %v534_v0  ;;  %466 = vmatprep.subr.mxu0 %v534_v0 }
  0x2e   :  { %440 = vmatpush3.msra.mxu1 %v152_v25  ;;  %467 = vmatpush3.msra.mxu0 %v250_v37 }
  0x2f   :  { %441 = vmatprep.subr.mxu1 %v534_v0  ;;  %468 = vmatprep.subr.mxu0 %v534_v0 }
  0x30   :  { %442 = vmatpush3.msra.mxu1 %v151_v26  ;;  %469 = vmatpush3.msra.mxu0 %v249_v38 }
  0x31   :  { %470 = vmatprep.subr.mxu0 %v534_v0 }
  0x32   :  { %471 = vmatpush3.msra.mxu0 %v248_v39 }
  0x33   :  { %472 = vmatprep.subr.mxu0 %v534_v0 }
  0x34   :  { %473 = vmatpush3.msra.mxu0 %v247_v45 }
  0x35   :  { %474 = vmatprep.subr.mxu0 %v534_v0 }
  0x36   :  { %475 = vmatpush3.msra.mxu0 %v246_v46 }
  0x37   :  { %476 = vmatprep.subr.mxu0 %v534_v0 }
  0x38   :  { %477 = vmatpush3.msra.mxu0 %v245_v47 }
  0xd8   :  { %v146_v41 = vpop.f32.mrf.mxu0 }
  0xd9   :  { %v147_v42 = vadd.f32 %v357_v40, %v146_v41 }
  0xda   :  { %v410_v43 = vpop.f32.mrf.mxu0 }
  0xdb   :  { %v150_v44 = vmax.f32 %v147_v42, 0.0 }
  0xdd   :  { %444 = vmatmul.mubr.f32.vlgmr.msra.gmra.mxu1 %v150_v44 }
 0x19d   :  { %v240_v49 = vpop.f32.mrf.mxu1 }
 0x19e   :  { %v241_v50 = vadd.f32 %v359_v48, %v240_v49 }
 0x19f   :  { %v445_v51 = vpop.f32.mrf.mxu1 }
 0x1a0   :  { %v244_v52 = vmax.f32 %v241_v50, 0.0 }
 0x1a2   :  { %479 = vmatmul.mubr.f32.vlgmr.msra.gmra.mxu0 %v244_v52 }
 0x262   :  { %v334_v54 = vpop.f32.mrf.mxu0 }
 0x263   :  { %v335_v55 = vadd.f32 %v360_v53, %v334_v54 }
 0x264   :  { %v480_v56 = vpop.f32.mrf.mxu0 }
 0x265   :  { %339 = vst.msk [vmem:[#allocation5] sm:$0xff] %vm338_vm2, %v335_v55 }
 0x266   :  { %518 = shalt.err (!%p515_p9)
}
 0x267   :  { %349 = dma.vmem_to_hbm [thread:$0]  %s347_s15, 128, %s758_s9, [#allocation4]  }
 0x268   :  { %529 = dma.done.wait [#allocation4], 128  }
 0x269   :  { %530 = vsyncadd [#allocation4], 4294967168 }
 0x26a   :  { %353 = vsyncpa [#allocation3], 1 }
 0x26b   :  { %354 = vsyncpa [#allocation4], 1 }

</bundles_post_ra>
